<compile_context>
chip_gen: v7x
topology: tpu7x:2x2x1
jax: 0.10.0
libtpu: 0.0.40
codegen_flags: <defaults>
</compile_context>

<pallas_src>
import jax
import jax.numpy as jnp
from jax.experimental import pallas as pl
from jax.experimental.pallas import tpu as pltpu


def _softmax_axis0_kernel(x_ref, o_ref):
    # x_ref: (S, TH) block in VMEM; reduction is over axis 0 (full extent).
    x = x_ref[...].astype(jnp.float32)          # no-op for f32 inputs
    m = jnp.max(x, axis=0, keepdims=True)       # stable-softmax max (XLU)
    e = jnp.exp(x - m)                          # EUP exp
    denom = jnp.sum(e, axis=0, keepdims=True)
    inv = pl.reciprocal(denom, approx=True)     # EUP vrcp; ~1e-3 rel. error max
    o_ref[...] = (e * inv).astype(o_ref.dtype)


def _round_up(n, m):
    return ((n + m - 1) // m) * m


def _vmem_capacity_bytes():
    try:
        return int(pltpu.get_tpu_info().vmem_capacity_bytes)
    except Exception:
        return 64 * 1024 * 1024   # conservative fallback: v7x per-TC VMEM


def _pick_tile_h(S, H, bytes_per_lane, vmem_cap):
    """Largest lane-dense tile fitting the VMEM budget, keeping >=2 grid steps."""
    if H <= 128:
        return H  # single full-width block; block last dim == full array dim
    budget = int(vmem_cap * 0.6)  # headroom for compiler scratch / regalloc
    cap_from_vmem = max(128, (budget // bytes_per_lane) // 128 * 128)
    # Keep the grid >= 2 parallel steps when H allows: feeds both v7x
    # TensorCores and keeps the DMA pipeline overlapped.
    split_cap = max(128, _round_up(-(-H // 2), 128))
    return min(2048, cap_from_vmem, split_cap, _round_up(H, 128))


def customed_softmax_stable(x, *, tile_h=None):
    """Softmax over axis 0 of a 2-D array, matching CustomedSoftmaxStable.forward."""
    S, H = x.shape
    itemsize = jnp.dtype(x.dtype).itemsize

    # Per-lane VMEM footprint: double-buffered input + output pipeline blocks
    # plus ~2 full-S f32 intermediates live inside the kernel (x cast, e).
    bytes_per_lane = S * (2 * itemsize + 2 * itemsize + 2 * 4)

    vmem_cap = _vmem_capacity_bytes()
    if bytes_per_lane * min(H, 128) > int(vmem_cap * 0.9):
        # TODO(synk): reduction axis too long to hold a full-S block in VMEM even
        # at 128 lanes; needs a two-pass / online-softmax kernel with a grid axis
        # over S ("arbitrary") and f32 scratch accumulators.
        raise NotImplementedError(
            f"softmax axis S={S} too long for the single-block kernel")

    if tile_h is None:
        tile_h = _pick_tile_h(S, H, bytes_per_lane, vmem_cap)
    elif tile_h != H and tile_h % 128 != 0:
        raise ValueError("tile_h must equal H or be a multiple of 128")

    vmem_limit = min(int(vmem_cap * 0.9),
                     max(bytes_per_lane * tile_h + (8 << 20), 32 << 20))

    grid = (pl.cdiv(H, tile_h),)   # ragged last block is masked on store
    return pl.pallas_call(
        _softmax_axis0_kernel,
        out_shape=jax.ShapeDtypeStruct((S, H), x.dtype),
        grid=grid,
        in_specs=[pl.BlockSpec((S, tile_h), lambda j: (0, j))],
        out_specs=pl.BlockSpec((S, tile_h), lambda j: (0, j)),
        compiler_params=pltpu.CompilerParams(
            dimension_semantics=("parallel",),
            vmem_limit_bytes=int(vmem_limit),
        ),
    )(x)


if __name__ == "__main__":
    key = jax.random.PRNGKey(0)
    # Small shape consistent with the module: seq=8 (softmax axis), hidden=256
    # (lane axis; 256 exercises a multi-step parallel grid).
    x = jax.random.normal(key, (8, 256), dtype=jnp.float32)

    out = jax.block_until_ready(customed_softmax_stable(x))

    # Reference check (plain JAX). Tolerance accounts for the approximate
    # EUP reciprocal used for the normalization (<= ~1e-3 relative error).
    ref = jax.nn.softmax(x, axis=0)
    assert out.shape == x.shape and out.dtype == x.dtype
    assert jnp.allclose(out, ref, atol=2e-3, rtol=2e-3), float(
        jnp.max(jnp.abs(out - ref)))

    print("KERNEL_OK")
</pallas_src>

<mosaic_0001>
module attributes {stable_mosaic.version = 11 : i64} {
  func.func @_softmax_axis0_kernel(%arg0: i32, %arg1: memref<8x128xf32, #tpu.memory_space<vmem>>, %arg2: memref<8x128xf32, #tpu.memory_space<vmem>>) attributes {dimension_semantics = [#tpu.dimension_semantics<parallel>], iteration_bounds = array<i64: 2>, scalar_prefetch = 0 : i64, scratch_operands = 0 : i64, tpu.core_type = #tpu.core_type<tc>, window_params = [{transform_indices = @transform_0, window_bounds = array<i64: 8, 128>}, {transform_indices = @transform_1, window_bounds = array<i64: 8, 128>}]} {
    %c0 = arith.constant 0 : index
    %c0_0 = arith.constant 0 : index
    %0 = vector.load %arg1[%c0, %c0_0] : memref<8x128xf32, #tpu.memory_space<vmem>>, vector<8x128xf32>
    %cst = arith.constant dense<0xFF800000> : vector<128xf32>
    %1 = vector.multi_reduction <maximumf>, %0, %cst [0] : vector<8x128xf32> to vector<128xf32>
    %2 = vector.shape_cast %1 : vector<128xf32> to vector<1x128xf32>
    %3 = vector.broadcast %2 : vector<1x128xf32> to vector<8x128xf32>
    %4 = arith.subf %0, %3 : vector<8x128xf32>
    %5 = math.exp %4 : vector<8x128xf32>
    %cst_1 = arith.constant dense<0.000000e+00> : vector<128xf32>
    %6 = vector.multi_reduction <add>, %5, %cst_1 [0] : vector<8x128xf32> to vector<128xf32>
    %7 = vector.shape_cast %6 : vector<128xf32> to vector<1x128xf32>
    %8 = tpu.reciprocal %7 {approx = true} : vector<1x128xf32> -> vector<1x128xf32>
    %9 = vector.broadcast %8 : vector<1x128xf32> to vector<8x128xf32>
    %10 = arith.mulf %5, %9 : vector<8x128xf32>
    %c0_2 = arith.constant 0 : index
    %c0_3 = arith.constant 0 : index
    %11 = vector.load %arg2[%c0_2, %c0_3] : memref<8x128xf32, #tpu.memory_space<vmem>>, vector<8x128xf32>
    tpu.vector_store %arg2[%c0_2, %c0_3], %10 {strides = array<i32>} : memref<8x128xf32, #tpu.memory_space<vmem>>, vector<8x128xf32>,
    return
  }
  func.func @transform_0(%arg0: i32) -> (i32, i32) {
    %c0_i32 = arith.constant 0 : i32
    %c0_i32_0 = arith.constant 0 : i32
    return %c0_i32, %arg0 : i32, i32
  }
  func.func @transform_1(%arg0: i32) -> (i32, i32) {
    %c0_i32 = arith.constant 0 : i32
    %c0_i32_0 = arith.constant 0 : i32
    return %c0_i32, %arg0 : i32, i32
  }
}

</mosaic_0001>

<bundles_post_ra>
// kernel: tpu_custom_call.1
= control target key start
LH: loop header
LB: loop body
LE: loop exit
PB: predicated region body
PF: predicated region fallthrough
CT: control target
= control target key end

     0   :  { %6 = vsyncpa [#allocation3], 0  ;;  %s568_s0 = inlined_call_operand.hbm [shape: f32[8,256], index: 0, kind: input, shape index: {}]   ;;  %s569_s1 = inlined_call_operand.hbm [shape: f32[8,256], index: 1, kind: output, shape index: {}]  }
   0x1   :  { %8 = vsyncpa [#allocation3 + $0x1], 0 }
   0x2   :  { %9 = vsyncpa [#allocation4], 0 }
   0x3   :  { %11 = vsyncpa [#allocation4 + $0x1], 0  ;;  %s407_s6 = smov 0   ;;  %s409_s7 = smov 0  }
   0x4   :  { %s411_s8 = smov 0   ;;  %s413_s9 = smov 0  }
   0x5 LB: > { %s428_s10 = sadd.s32 4294967295, %s393_s9   ;;  %s235_s11 = sadd.s32 4294967294, %s393_s9   ;;  %s393_s9 = sphi %s413_s9, %s584_s9   ;;  %s389_s8 = sphi %s411_s8, %s583_s8   ;;  %s385_s7 = sphi %s409_s7, %s582_s7   ;;  %s381_s6 = sphi %s407_s6, %s581_s6  }
   0x6   : > { %s432_s12 = sadd.s32 1, %s393_s9   ;;  %s24_s13 = sadd.s32 1, %s389_s8 }
   0x7   : > { %s21_s14 = ssub.s32 %s393_s9, %s432_s12  ;;  %p31_p0 = scmp.ne.s32.totalorder %s389_s8, %s385_s7 }
   0x8   : > { %p22_p1 = scmp.eq.s32.totalorder %s21_s14, 0  ;;  %p32_p2 = scmp.eq.s32.totalorder %s393_s9, 0 }
   0x9   : > { %p37_p3 = scmp.ne.s32.totalorder %s385_s7, %s381_s6  ;;  %p38_p4 = scmp.eq.s32.totalorder %s428_s10, 0 }
   0xa   : > { %s444_s15 = scalar_select %p22_p1, %s389_s8, %s24_s13  }
   0xb   : > { %p446_p5 = por %p32_p2, %p31_p0  ;;  %p450_p6 = por %p38_p4, %p37_p3 }
   0xc   : > { %p61_p7 = scmp.eq.s32.totalorder %s428_s10, 1  ;;  %p67_p8 = scmp.eq.s32.totalorder %s235_s11, 1 }
   0xd   : > { %p259_p10 = scmp.lt.s32.totalorder %s393_s9, 2  ;;  %s87_s20 = sand.u32 1, %s389_s8  }
   0xe   : > { %p457_p11 = por %p61_p7, %p31_p0  ;;  %p461_p12 = por %p67_p8, %p37_p3 }
   0xf   : > { %s239_s21 = sshll.u32 %s393_s9, 7  ;;  %s238_s22 = sshll.u32 %s87_s20, 3 }
  0x10   : > { %s573_s18 = scalar_select %p457_p11, 1, 0 }
  0x11   : > { %s574_s19 = scalar_select %p461_p12, 1, 0 }
  0x12   : > { %s470_s25 = scalar_lea.hbm %s568_s0, %s239_s21  ;;  %s91_s26 = scalar_lea.vmem [#allocation2], %s238_s22 }
  0x13   : > { %s98_s27 = sshll.u32 %s91_s26, 4  ;;  %p474_p13 = pnand %p259_p10, %p446_p5  ;;  %s478_s27 = int_to_ptr.vmem [resolvable:$true] %s98_s27 }
  0x14   : > { %s88_s29 = scalar_lea.sflag [#allocation3], %s87_s20  ;;  %s297_s30 = scalar_lea.hbm %s470_s25, 128 }
  0x15   : > { %p298_p2 = scmp.ne.s32.totalorder %s470_s25, %s297_s30  ;;  %p299_p3 = pneg %p474_p13 }
  0x16   : > { %s302_s4 = scalar_lea.hbm %s568_s0, 256  ;;  %p303_p5 = scmp.lt.u32.totalorder %s470_s25, %s568_s0 }
  0x17   : > { %p300_p4 = pnand %p299_p3, %p298_p2  ;;  %p304_p8 = scmp.lt.u32.totalorder %s302_s4, %s297_s30 }
  0x18   : > { %p306_p9 = scmp.lt.u32.totalorder %s297_s30, %s470_s25 }
  0x19   : > { %p301_p7 = pneg %p300_p4  ;;  %p305_p10 = por %p304_p8, %p303_p5 }
  0x1b   : > { %p307_p0 = por %p306_p9, %p305_p10 }
  0x1d   : > { %p308_p1 = pnand %p307_p0, %p301_p7 }
  0x1f   : > { %311 = shalt.err (!%p308_p1)
}
  0x20   : > { %s312_s13 = scalar_lea.vmem %s478_s27, 128  ;;  %s395_s14 = smov [#allocation2]  }
  0x21   : > { %p313_p2 = scmp.ne.s32.totalorder %s478_s27, %s312_s13  ;;  %s317_s16 = sshll.u32 %s395_s14, 4  ;;  %s318_s16 = int_to_ptr.vmem [resolvable:$false] %s317_s16 }
  0x22   : > { %s319_s20 = scalar_lea.vmem %s318_s16, 256  ;;  %p320_p11 = scmp.lt.s32.totalorder %s478_s27, %s318_s16 }
  0x23   : > { %p315_p4 = pnand %p313_p2, %p299_p3  ;;  %p321_p5 = scmp.lt.s32.totalorder %s319_s20, %s312_s13 }
  0x25   : > { %p316_p12 = pneg %p315_p4  ;;  %p322_p8 = por %p321_p5, %p320_p11 }
  0x27   : > { %p323_p9 = pnand %p322_p8, %p316_p12 }
  0x29   : > { %326 = shalt.err (!%p323_p9)
}
  0x2a   : > { %254 = dma.hbm_to_vmem [thread:$0]  (!%p474_p13), %s470_s25, 128, %s478_s27, %s88_s29  }
  0x2b   : > { %p576_p0 = scmp.lt.s32.totalorder %s393_s9, 3  ;;  %p577_p1 = scmp.ge.s32.totalorder %s393_s9, 1 }
  0x2d   : > { %p104_p3 = pnand %p577_p1, %p576_p0 }
  0x2e   : > { %s512_s21 = sand.u32 (!%p104_p3), 1, %s385_s7  }
  0x2f   : > { %107 = sbr.rel (%p104_p3) target bundleno = 122 (0x7a), region = 24  ;;  %s241_s22 = sshll.u32 (!%p104_p3), %s512_s21, 3 }
  0x30   : > { %s110_s23 = scalar_lea.sflag (!%p104_p3), [#allocation3], %s512_s21  ;;  %s113_s24 = scalar_lea.vmem (!%p104_p3), [#allocation2], %s241_s22 }
  0x36   : > { %372 = dma.done.wait (%p450_p6), %s110_s23, 128  }
  0x37   : > { %374 = vsyncadd (%p450_p6), %s110_s23, 4294967168  ;;  %v132_v0 = vld [vmem:[%s113_s24] sm:$0xff]  ;;  %s131_s17 = scalar_lea.vmem [#allocation5], %s241_s22  ;;  %s244_s26 = sshll.u32 %s428_s10, 7 }
  0x38   : > { %v133_v1 = vrot.slane %v132_v0, 4  ;;  %s165_s25 = sshll.u32 %s131_s17, 4  ;;  %s526_s29 = scalar_lea.hbm %s569_s1, %s244_s26  ;;  %s521_s25 = int_to_ptr.vmem [resolvable:$true] %s165_s25 }
  0x39   : > { %s152_s30 = scalar_lea.sflag [#allocation4], %s512_s21  ;;  %s327_s2 = scalar_lea.vmem %s521_s25, 128 }
  0x3a   : > { %v134_v2 = vmax.f32 %v132_v0, %v133_v1  ;;  %p328_p6 = scmp.ne.s32.totalorder %s521_s25, %s327_s2  ;;  %p578_p11 = scmp.ne.s32.totalorder %s573_s18, 0 }
  0x3b   : > { %s396_s10 = smov [#allocation5]  }
  0x3c   : > { %v135_v3 = vrot.slane %v134_v2, 2  ;;  %p329_p12 = pnand %p328_p6, %p578_p11  ;;  %s331_s3 = sshll.u32 %s396_s10, 4  ;;  %s332_s3 = int_to_ptr.vmem [resolvable:$false] %s331_s3 }
  0x3d   : > { %s333_s4 = scalar_lea.vmem %s332_s3, 256  ;;  %p334_p7 = scmp.lt.s32.totalorder %s521_s25, %s332_s3 }
  0x3e   : > { %v136_v4 = vmax.f32 %v134_v2, %v135_v3  ;;  %p330_p13 = pneg %p329_p12  ;;  %p335_p10 = scmp.lt.s32.totalorder %s333_s4, %s327_s2 }
  0x40   : > { %v137_v5 = vrot.slane %v136_v4, 1  ;;  %p336_p2 = por %p335_p10, %p334_p7 }
  0x42   : > { %v138_v6 = vmax.f32 %v136_v4, %v137_v5  ;;  %p337_p4 = pnand %p336_p2, %p330_p13 }
  0x44   : > { %v139_v7 = vsub.f32 %v132_v0, %v138_v6 }
  0x46   : > { %v140_v8 = vmul.f32 1.442695, %v139_v7 }
  0x48   : > { %293 = vpow2.f32 %v140_v8 }
  0x52   : > { %v294_v9 = vpop.eup %293 }
  0x53   : > { %v142_v10 = vrot.slane %v294_v9, 4 }
  0x55   : > { %v143_v11 = vadd.f32 %v294_v9, %v142_v10 }
  0x57   : > { %v144_v12 = vrot.slane %v143_v11, 2 }
  0x59   : > { %v145_v13 = vadd.f32 %v144_v12, %v143_v11 }
  0x5b   : > { %v146_v14 = vrot.slane %v145_v13, 1 }
  0x5d   : > { %v147_v15 = vadd.f32 %v146_v14, %v145_v13 }
  0x5f   : > { %295 = vrcp.f32 %v147_v15 }
  0x69   : > { %v296_v16 = vpop.eup %295 }
  0x6a   : > { %v149_v17 = vmul.f32 %v296_v16, %v294_v9 }
  0x6c   : > { %150 = vst [vmem:[%s131_s17] sm:$0xff] %v149_v17 }
  0x6d   : > { %340 = shalt.err (!%p337_p4)
}
  0x6e   : > { %s341_s5 = scalar_lea.hbm %s526_s29, 128  ;;  %s345_s14 = scalar_lea.hbm %s569_s1, 256 }
  0x6f   : > { %p342_p5 = scmp.ne.s32.totalorder %s526_s29, %s341_s5  ;;  %p346_p0 = scmp.lt.u32.totalorder %s526_s29, %s569_s1 }
  0x70   : > { %p347_p1 = scmp.lt.u32.totalorder %s345_s14, %s341_s5  ;;  %p349_p6 = scmp.lt.u32.totalorder %s341_s5, %s526_s29 }
  0x71   : > { %p343_p8 = pnand %p342_p5, %p578_p11 }
  0x72   : > { %p348_p3 = por %p347_p1, %p346_p0 }
  0x73   : > { %p344_p9 = pneg %p343_p8 }
  0x74   : > { %p350_p12 = por %p349_p6, %p348_p3 }
  0x76   : > { %p351_p13 = pnand %p350_p12, %p344_p9 }
  0x78   : > { %354 = shalt.err (!%p351_p13)
}
  0x79   : > { %249 = dma.vmem_to_hbm [thread:$0]  (%p578_p11), %s521_s25, 128, %s526_s29, %s152_s30  }
  0x7a PF: > { %s177_s21 = sand.u32 1, %s381_s6   ;;  %p579_p7 = scmp.ne.s32.totalorder %s574_s19, 0 }
  0x7b   : > { %p580_p10 = scmp.ge.s32.totalorder %s393_s9, 2  ;;  %s178_s22 = scalar_lea.sflag [#allocation4], %s177_s21 }
  0x7d   : > { %p256_p2 = pnand %p580_p10, %p579_p7 }
  0x7f   : > { %376 = dma.done.wait (!%p256_p2), %s178_s22, 128  }
  0x80   : > { %378 = vsyncadd (!%p256_p2), %s178_s22, 4294967168  ;;  %p14_p4 = scmp.ge.s32.totalorder %s432_s12, 4   ;;  %s581_s6 = smov %s385_s7 }
  0x81   : > { %s582_s7 = smov %s389_s8  ;;  %s583_s8 = smov %s444_s15 }
  0x82   : > { %s584_s9 = smov %s432_s12  ;;  %16 = sbr.rel (!%p14_p4) target bundleno = 5 (0x5), region = 69 }
  0x89   :  { %183 = vsyncpa [#allocation3], 1 }
  0x8a   :  { %185 = vsyncpa [#allocation3 + $0x1], 1 }
  0x8b   :  { %186 = vsyncpa [#allocation4], 1 }
  0x8c   :  { %188 = vsyncpa [#allocation4 + $0x1], 1 }

</bundles_post_ra>
